<compile_context>
chip_gen: v6e
topology: v6e:2x2x1
jax: 0.10.0
libtpu: 0.0.40
codegen_flags: <defaults>
</compile_context>

<pallas_src>
import functools

import jax
import jax.numpy as jnp
from jax.experimental import pallas as pl
from jax.experimental.pallas import tpu as pltpu


def _fused_conv3x3_relu_kernel(x_ref, w_ref, b_ref, o_ref, *, kh, kw, wp):
    """Fused conv(kh x kw, pad=1) + bias + ReLU on a lane-flattened activation.

    x_ref: (C, NLANE)     zero-padded NCHW activations; lane index =
                          b*Hp*Wp + hp*Wp + wp (zero tail beyond the valid
                          B*Hp*Wp columns provides shift headroom)
    w_ref: (kh*kw, O, C)  per-tap weight slices, tap k = i*kw + j
    b_ref: (O, 1)         bias column (broadcast over lanes)
    o_ref: (O, NC)        NC = round_up(B*Hp*Wp, 128) -> unmasked lane-dense stores
    """
    nc = o_ref.shape[-1]
    # Start the accumulator from the broadcast bias: fuses the bias add into
    # the accumulation chain instead of a separate pass over (O, NC).
    acc = jnp.broadcast_to(b_ref[...], o_ref.shape).astype(jnp.float32)
    for k in range(kh * kw):                       # static unroll: kh*kw taps
        d = (k // kw) * wp + (k % kw)              # static lane shift for this tap
        x_shift = x_ref[:, d:d + nc]               # (C, NC) shifted activation view
        # NOTE: on v6e/v7x at larger B/C, cast w/x_shift to bf16 here (keep f32 acc).
        acc = acc + jnp.dot(w_ref[k], x_shift, preferred_element_type=jnp.float32)
    o_ref[...] = jnp.maximum(acc, 0.0).astype(o_ref.dtype)


def distributed_net_forward(x, weight, bias, *, devices=None):
    """Pallas implementation of distributed_Net.forward (== forward_test: the
    wrapped conv+ReLU has no dropout/batchnorm, so train()/eval() is a no-op).

    x:      (B, C, H, W) float32 NCHW
    weight: (O, C, 3, 3) float32 (PyTorch Conv2d layout)
    bias:   (O,)         float32
    returns (B, O, H, W) float32
    """
    del devices  # DataParallel split is value-identical; single TC, single grid step.
    B, C, H, W = x.shape
    O, _, kh, kw = weight.shape
    pad = 1
    Hp, Wp = H + 2 * pad, W + 2 * pad
    N = B * Hp * Wp                                   # valid flattened columns (648)
    LANE = 128
    NC = ((N + LANE - 1) // LANE) * LANE              # lane-dense output columns (768)
    d_max = (kh - 1) * Wp + (kw - 1)                  # largest static shift (38)
    NLANE = ((NC + d_max + LANE - 1) // LANE) * LANE  # input columns incl. shift headroom

    # Spatial zero-pad, channels to sublanes, flatten (b, hp, wp) on lanes, zero tail.
    xp = jnp.pad(x, ((0, 0), (0, 0), (pad, pad), (pad, pad)))     # (B, C, Hp, Wp)
    x_flat = jnp.transpose(xp, (1, 0, 2, 3)).reshape(C, N)        # (C, N)
    x_ext = jnp.pad(x_flat, ((0, 0), (0, NLANE - N)))             # (C, NLANE)

    # Weight taps (kh*kw, O, C): tap k=i*kw+j holds weight[:, :, i, j]; bias as (O,1).
    w_taps = jnp.transpose(weight, (2, 3, 0, 1)).reshape(kh * kw, O, C)
    b_col = bias.reshape(O, 1)

    kernel = functools.partial(_fused_conv3x3_relu_kernel, kh=kh, kw=kw, wp=Wp)

    out_flat = pl.pallas_call(
        kernel,
        out_shape=jax.ShapeDtypeStruct((O, NC), jnp.float32),
        grid=(1,),                                    # single step: whole problem fits VMEM
        in_specs=[
            pl.BlockSpec((C, NLANE), lambda i: (0, 0)),
            pl.BlockSpec((kh * kw, O, C), lambda i: (0, 0, 0)),
            pl.BlockSpec((O, 1), lambda i: (0, 0)),
        ],
        out_specs=pl.BlockSpec((O, NC), lambda i: (0, 0)),
        compiler_params=pltpu.CompilerParams(dimension_semantics=("arbitrary",)),
    )(x_ext, w_taps, b_col)

    # (O, NC) -> valid columns -> (O, B, Hp, Wp) -> crop to (O, B, H, W) -> NCHW.
    out = out_flat[:, :N].reshape(O, B, Hp, Wp)[:, :, :H, :W]
    return jnp.transpose(out, (1, 0, 2, 3))


def _reference_forward(x, weight, bias):
    """Pure-JAX reference (conv + bias + relu) for correctness check."""
    y = jax.lax.conv_general_dilated(
        x, weight, window_strides=(1, 1), padding=((1, 1), (1, 1)),
        dimension_numbers=("NCHW", "OIHW", "NCHW"))
    return jnp.maximum(y + bias.reshape(1, -1, 1, 1), 0.0)


if __name__ == "__main__":
    key = jax.random.PRNGKey(0)
    kx, kw_, kb = jax.random.split(key, 3)

    B, C, H, W = 2, 4, 16, 16
    O = 8

    x = jax.random.normal(kx, (B, C, H, W), dtype=jnp.float32)
    # Deterministic synthetic parameters (mimic Conv2d(4, 8, 3, padding=1)).
    weight = 0.1 * jax.random.normal(kw_, (O, C, 3, 3), dtype=jnp.float32)
    bias = 0.05 * jax.random.normal(kb, (O,), dtype=jnp.float32)

    y = jax.block_until_ready(distributed_net_forward(x, weight, bias))
    y_ref = jax.block_until_ready(_reference_forward(x, weight, bias))

    assert y.shape == (B, O, H, W)
    assert jnp.max(jnp.abs(y - y_ref)) < 1e-4

    print("KERNEL_OK")
</pallas_src>

<mosaic_0001>
module attributes {stable_mosaic.version = 11 : i64} {
  func.func @_fused_conv3x3_relu_kernel(%arg0: i32, %arg1: memref<4x896xf32, #tpu.memory_space<vmem>>, %arg2: memref<9x8x4xf32, #tpu.memory_space<vmem>>, %arg3: memref<8x1xf32, #tpu.memory_space<vmem>>, %arg4: memref<8x768xf32, #tpu.memory_space<vmem>>) attributes {dimension_semantics = [#tpu.dimension_semantics<arbitrary>], iteration_bounds = array<i64: 1>, scalar_prefetch = 0 : i64, scratch_operands = 0 : i64, tpu.core_type = #tpu.core_type<tc>, window_params = [{pipeline_mode = #tpu.pipeline_mode<synchronous>, transform_indices = @transform_0, window_bounds = array<i64: 4, 896>}, {pipeline_mode = #tpu.pipeline_mode<synchronous>, transform_indices = @transform_1, window_bounds = array<i64: 9, 8, 4>}, {pipeline_mode = #tpu.pipeline_mode<synchronous>, transform_indices = @transform_2, window_bounds = array<i64: 8, 1>}, {pipeline_mode = #tpu.pipeline_mode<synchronous>, transform_indices = @transform_3, window_bounds = array<i64: 8, 768>}]} {
    %c0 = arith.constant 0 : index
    %c0_0 = arith.constant 0 : index
    %0 = vector.load %arg3[%c0, %c0_0] : memref<8x1xf32, #tpu.memory_space<vmem>>, vector<8x1xf32>
    %1 = vector.shape_cast %0 : vector<8x1xf32> to vector<8x1xf32>
    %2 = vector.broadcast %1 : vector<8x1xf32> to vector<8x768xf32>
    %c0_1 = arith.constant 0 : index
    %c0_2 = arith.constant 0 : index
    %3 = vector.load %arg1[%c0_1, %c0_2] : memref<4x896xf32, #tpu.memory_space<vmem>>, vector<4x768xf32>
    %c0_3 = arith.constant 0 : index
    %c0_4 = arith.constant 0 : index
    %c0_5 = arith.constant 0 : index
    %4 = vector.load %arg2[%c0_3, %c0_4, %c0_5] : memref<9x8x4xf32, #tpu.memory_space<vmem>>, vector<1x8x4xf32>
    %5 = vector.shape_cast %4 : vector<1x8x4xf32> to vector<8x4xf32>
    %cst = arith.constant dense<0.000000e+00> : vector<8x768xf32>
    %6 = tpu.matmul %5, %3, %cst {dimension_numbers = #tpu.dot_dimension_numbers<[1], [0], [0], [1], [0, 0, 1, 1], [], []>} : vector<8x4xf32>, vector<4x768xf32>, vector<8x768xf32> -> vector<8x768xf32>
    %7 = arith.addf %2, %6 : vector<8x768xf32>
    %c0_6 = arith.constant 0 : index
    %c1 = arith.constant 1 : index
    %8 = vector.load %arg1[%c0_6, %c1] : memref<4x896xf32, #tpu.memory_space<vmem>>, vector<4x768xf32>
    %c1_7 = arith.constant 1 : index
    %c0_8 = arith.constant 0 : index
    %c0_9 = arith.constant 0 : index
    %9 = vector.load %arg2[%c1_7, %c0_8, %c0_9] : memref<9x8x4xf32, #tpu.memory_space<vmem>>, vector<1x8x4xf32>
    %10 = vector.shape_cast %9 : vector<1x8x4xf32> to vector<8x4xf32>
    %cst_10 = arith.constant dense<0.000000e+00> : vector<8x768xf32>
    %11 = tpu.matmul %10, %8, %cst_10 {dimension_numbers = #tpu.dot_dimension_numbers<[1], [0], [0], [1], [0, 0, 1, 1], [], []>} : vector<8x4xf32>, vector<4x768xf32>, vector<8x768xf32> -> vector<8x768xf32>
    %12 = arith.addf %7, %11 : vector<8x768xf32>
    %c0_11 = arith.constant 0 : index
    %c2 = arith.constant 2 : index
    %13 = vector.load %arg1[%c0_11, %c2] : memref<4x896xf32, #tpu.memory_space<vmem>>, vector<4x768xf32>
    %c2_12 = arith.constant 2 : index
    %c0_13 = arith.constant 0 : index
    %c0_14 = arith.constant 0 : index
    %14 = vector.load %arg2[%c2_12, %c0_13, %c0_14] : memref<9x8x4xf32, #tpu.memory_space<vmem>>, vector<1x8x4xf32>
    %15 = vector.shape_cast %14 : vector<1x8x4xf32> to vector<8x4xf32>
    %cst_15 = arith.constant dense<0.000000e+00> : vector<8x768xf32>
    %16 = tpu.matmul %15, %13, %cst_15 {dimension_numbers = #tpu.dot_dimension_numbers<[1], [0], [0], [1], [0, 0, 1, 1], [], []>} : vector<8x4xf32>, vector<4x768xf32>, vector<8x768xf32> -> vector<8x768xf32>
    %17 = arith.addf %12, %16 : vector<8x768xf32>
    %c0_16 = arith.constant 0 : index
    %c18 = arith.constant 18 : index
    %18 = vector.load %arg1[%c0_16, %c18] : memref<4x896xf32, #tpu.memory_space<vmem>>, vector<4x768xf32>
    %c3 = arith.constant 3 : index
    %c0_17 = arith.constant 0 : index
    %c0_18 = arith.constant 0 : index
    %19 = vector.load %arg2[%c3, %c0_17, %c0_18] : memref<9x8x4xf32, #tpu.memory_space<vmem>>, vector<1x8x4xf32>
    %20 = vector.shape_cast %19 : vector<1x8x4xf32> to vector<8x4xf32>
    %cst_19 = arith.constant dense<0.000000e+00> : vector<8x768xf32>
    %21 = tpu.matmul %20, %18, %cst_19 {dimension_numbers = #tpu.dot_dimension_numbers<[1], [0], [0], [1], [0, 0, 1, 1], [], []>} : vector<8x4xf32>, vector<4x768xf32>, vector<8x768xf32> -> vector<8x768xf32>
    %22 = arith.addf %17, %21 : vector<8x768xf32>
    %c0_20 = arith.constant 0 : index
    %c19 = arith.constant 19 : index
    %23 = vector.load %arg1[%c0_20, %c19] : memref<4x896xf32, #tpu.memory_space<vmem>>, vector<4x768xf32>
    %c4 = arith.constant 4 : index
    %c0_21 = arith.constant 0 : index
    %c0_22 = arith.constant 0 : index
    %24 = vector.load %arg2[%c4, %c0_21, %c0_22] : memref<9x8x4xf32, #tpu.memory_space<vmem>>, vector<1x8x4xf32>
    %25 = vector.shape_cast %24 : vector<1x8x4xf32> to vector<8x4xf32>
    %cst_23 = arith.constant dense<0.000000e+00> : vector<8x768xf32>
    %26 = tpu.matmul %25, %23, %cst_23 {dimension_numbers = #tpu.dot_dimension_numbers<[1], [0], [0], [1], [0, 0, 1, 1], [], []>} : vector<8x4xf32>, vector<4x768xf32>, vector<8x768xf32> -> vector<8x768xf32>
    %27 = arith.addf %22, %26 : vector<8x768xf32>
    %c0_24 = arith.constant 0 : index
    %c20 = arith.constant 20 : index
    %28 = vector.load %arg1[%c0_24, %c20] : memref<4x896xf32, #tpu.memory_space<vmem>>, vector<4x768xf32>
    %c5 = arith.constant 5 : index
    %c0_25 = arith.constant 0 : index
    %c0_26 = arith.constant 0 : index
    %29 = vector.load %arg2[%c5, %c0_25, %c0_26] : memref<9x8x4xf32, #tpu.memory_space<vmem>>, vector<1x8x4xf32>
    %30 = vector.shape_cast %29 : vector<1x8x4xf32> to vector<8x4xf32>
    %cst_27 = arith.constant dense<0.000000e+00> : vector<8x768xf32>
    %31 = tpu.matmul %30, %28, %cst_27 {dimension_numbers = #tpu.dot_dimension_numbers<[1], [0], [0], [1], [0, 0, 1, 1], [], []>} : vector<8x4xf32>, vector<4x768xf32>, vector<8x768xf32> -> vector<8x768xf32>
    %32 = arith.addf %27, %31 : vector<8x768xf32>
    %c0_28 = arith.constant 0 : index
    %c36 = arith.constant 36 : index
    %33 = vector.load %arg1[%c0_28, %c36] : memref<4x896xf32, #tpu.memory_space<vmem>>, vector<4x768xf32>
    %c6 = arith.constant 6 : index
    %c0_29 = arith.constant 0 : index
    %c0_30 = arith.constant 0 : index
    %34 = vector.load %arg2[%c6, %c0_29, %c0_30] : memref<9x8x4xf32, #tpu.memory_space<vmem>>, vector<1x8x4xf32>
    %35 = vector.shape_cast %34 : vector<1x8x4xf32> to vector<8x4xf32>
    %cst_31 = arith.constant dense<0.000000e+00> : vector<8x768xf32>
    %36 = tpu.matmul %35, %33, %cst_31 {dimension_numbers = #tpu.dot_dimension_numbers<[1], [0], [0], [1], [0, 0, 1, 1], [], []>} : vector<8x4xf32>, vector<4x768xf32>, vector<8x768xf32> -> vector<8x768xf32>
    %37 = arith.addf %32, %36 : vector<8x768xf32>
    %c0_32 = arith.constant 0 : index
    %c37 = arith.constant 37 : index
    %38 = vector.load %arg1[%c0_32, %c37] : memref<4x896xf32, #tpu.memory_space<vmem>>, vector<4x768xf32>
    %c7 = arith.constant 7 : index
    %c0_33 = arith.constant 0 : index
    %c0_34 = arith.constant 0 : index
    %39 = vector.load %arg2[%c7, %c0_33, %c0_34] : memref<9x8x4xf32, #tpu.memory_space<vmem>>, vector<1x8x4xf32>
    %40 = vector.shape_cast %39 : vector<1x8x4xf32> to vector<8x4xf32>
    %cst_35 = arith.constant dense<0.000000e+00> : vector<8x768xf32>
    %41 = tpu.matmul %40, %38, %cst_35 {dimension_numbers = #tpu.dot_dimension_numbers<[1], [0], [0], [1], [0, 0, 1, 1], [], []>} : vector<8x4xf32>, vector<4x768xf32>, vector<8x768xf32> -> vector<8x768xf32>
    %42 = arith.addf %37, %41 : vector<8x768xf32>
    %c0_36 = arith.constant 0 : index
    %c38 = arith.constant 38 : index
    %43 = vector.load %arg1[%c0_36, %c38] : memref<4x896xf32, #tpu.memory_space<vmem>>, vector<4x768xf32>
    %c8 = arith.constant 8 : index
    %c0_37 = arith.constant 0 : index
    %c0_38 = arith.constant 0 : index
    %44 = vector.load %arg2[%c8, %c0_37, %c0_38] : memref<9x8x4xf32, #tpu.memory_space<vmem>>, vector<1x8x4xf32>
    %45 = vector.shape_cast %44 : vector<1x8x4xf32> to vector<8x4xf32>
    %cst_39 = arith.constant dense<0.000000e+00> : vector<8x768xf32>
    %46 = tpu.matmul %45, %43, %cst_39 {dimension_numbers = #tpu.dot_dimension_numbers<[1], [0], [0], [1], [0, 0, 1, 1], [], []>} : vector<8x4xf32>, vector<4x768xf32>, vector<8x768xf32> -> vector<8x768xf32>
    %47 = arith.addf %42, %46 : vector<8x768xf32>
    %cst_40 = arith.constant 0.000000e+00 : f32
    %48 = vector.broadcast %cst_40 : f32 to vector<8x768xf32>
    %49 = arith.maximumf %47, %48 : vector<8x768xf32>
    %c0_41 = arith.constant 0 : index
    %c0_42 = arith.constant 0 : index
    %50 = vector.load %arg4[%c0_41, %c0_42] : memref<8x768xf32, #tpu.memory_space<vmem>>, vector<8x768xf32>
    tpu.vector_store %arg4[%c0_41, %c0_42], %49 {strides = array<i32>} : memref<8x768xf32, #tpu.memory_space<vmem>>, vector<8x768xf32>,
    return
  }
  func.func @transform_0(%arg0: i32) -> (i32, i32) {
    %c0_i32 = arith.constant 0 : i32
    %c0_i32_0 = arith.constant 0 : i32
    %c0_i32_1 = arith.constant 0 : i32
    return %c0_i32, %c0_i32_0 : i32, i32
  }
  func.func @transform_1(%arg0: i32) -> (i32, i32, i32) {
    %c0_i32 = arith.constant 0 : i32
    %c0_i32_0 = arith.constant 0 : i32
    %c0_i32_1 = arith.constant 0 : i32
    %c0_i32_2 = arith.constant 0 : i32
    return %c0_i32, %c0_i32_0, %c0_i32_1 : i32, i32, i32
  }
  func.func @transform_2(%arg0: i32) -> (i32, i32) {
    %c0_i32 = arith.constant 0 : i32
    %c0_i32_0 = arith.constant 0 : i32
    %c0_i32_1 = arith.constant 0 : i32
    return %c0_i32, %c0_i32_0 : i32, i32
  }
  func.func @transform_3(%arg0: i32) -> (i32, i32) {
    %c0_i32 = arith.constant 0 : i32
    %c0_i32_0 = arith.constant 0 : i32
    %c0_i32_1 = arith.constant 0 : i32
    return %c0_i32, %c0_i32_0 : i32, i32
  }
}

</mosaic_0001>

<bundles_post_ra>
// kernel: tpu_custom_call.1
= control target key start
LH: loop header
LB: loop body
LE: loop exit
PB: predicated region body
PF: predicated region fallthrough
CT: control target
= control target key end

     0   :  { %vm35_vm0 = vcmask 1043456   ;;  %s2563_s16 = smov 127   ;;  %v2564_v7 = vmov 0.0   ;;  %vm31_vm1 = vcmask 31744   ;;  %s2895_s0 = inlined_call_operand.vmem [shape: f32[4,896], index: 0, kind: input, shape index: {}]   ;;  %s2896_s1 = inlined_call_operand.vmem [shape: f32[9,8,4], index: 1, kind: input, shape index: {}]   ;;  %s2897_s2 = inlined_call_operand.vmem [shape: f32[8,1], index: 2, kind: input, shape index: {}]   ;;  %s2898_s3 = inlined_call_operand.hbm [shape: f32[8,768], index: 3, kind: output, shape index: {}]  }
   0x1   :  { %v2597_v0 = vld [vmem:[%s2895_s0 + $0x8] sm:$0xff]  ;;  %v2602_v1 = vld [vmem:[%s2895_s0] sm:$0xff]  ;;  %v2619_v4 = vld [vmem:[%s2895_s0 + $0x10] sm:$0xff]  ;;  %112 = vmatprep.mubr.f32.mxu0 %v2564_v7 }
   0x2   :  { %v2606_v2 = vcombine.high %v2597_v0, %v2597_v0  ;;  %v2610_v3 = vcombine.high %v2602_v1, %v2602_v1  ;;  %v2623_v5 = vcombine.high %v2619_v4, %v2619_v4  ;;  %v24_v6 = vld [vmem:[%s2896_s1] sm:$0xff] }
   0x4   :  { %286 = vrot.lane.b32.xlu1 %v2606_v2, %s2563_s16  ;;  %282 = vrot.lane.b32.xlu0 %v2610_v3, %s2563_s16 }
   0x5   :  { %2437 = vmatprep.subr.msk.mxu0 %vm35_vm0, %v2610_v3  ;;  %2440 = vmatprep.subr.msk.mxu1 %vm35_vm0, %v2606_v2 }
   0x6   :  { %2438 = vmatpush1.msk.msra.mxu0 %vm35_vm0, %v2602_v1 }
   0x7   :  { %8 = vsyncpa [#allocation3], 0  ;;  %2439 = vmatmul.mubr.msk.f32.vlgmr.msra.gmra.mxu0 %vm31_vm1, %v24_v6  ;;  %2443 = vmatprep.subr.msk.mxu0 %vm35_vm0, %v2623_v5  ;;  %v270_v8 = vld [vmem:[%s2895_s0 + $0x18] sm:$0xf]  ;;  %s2565_s23 = smov 126   ;;  %s2566_s26 = smov 110  }
   0x8   :  { %288 = vrot.lane.b32.xlu1 %v2619_v4, %s2563_s16  ;;  %284 = vrot.lane.b32.xlu0 %v2597_v0, %s2563_s16  ;;  %v538_v9 = vld [vmem:[%s2895_s0 + $0x18] sm:$0xf]  ;;  %s2567_s29 = smov 109   ;;  %s2568_s5 = smov 108   ;;  %v2572_v15 = vmov 0   ;;  %v15_v17 = vld [vmem:[%s2897_s2] sm:$0xff] }
   0x9   :  { %2441 = vmatpush1.msk.msra.mxu1 %vm35_vm0, %v2597_v0  ;;  %2444 = vmatpush1.msk.msra.mxu0 %vm35_vm0, %v2619_v4  ;;  %v806_v10 = vld [vmem:[%s2895_s0 + $0x18] sm:$0xf]  ;;  %s2569_s8 = smov 92   ;;  %s2570_s11 = smov 91   ;;  %vm294_vm2 = vcmask 1039360   ;;  %v2446_v25 = vld [vmem:[%s2896_s1 + $0x8] sm:$0xff] }
   0xa   :  { %254 = vmatprep.mubr.f32.mxu0 %v2564_v7  ;;  %183 = vmatprep.mubr.f32.mxu1 %v2564_v7  ;;  %v1074_v11 = vld [vmem:[%s2895_s0 + $0x18] sm:$0xf]  ;;  %s2571_s14 = smov 90   ;;  %vm562_vm3 = vcmask 1031168   ;;  %v2456_v37 = vld [vmem:[%s2896_s1 + $0x10] sm:$0xff]  ;;  %vm830_vm4 = vcmask 900096  }
   0xb   :  { %2445 = vmatmul.mubr.msk.f32.vlgmr.msra.gmra.mxu0 %vm31_vm1, %v24_v6  ;;  %2442 = vmatmul.mubr.msk.f32.vlgmr.msra.gmra.mxu1 %vm31_vm1, %v24_v6  ;;  %v1342_v12 = vld [vmem:[%s2895_s0 + $0x18] sm:$0xf]  ;;  %vm1098_vm5 = vcmask 891904   ;;  %vm1366_vm6 = vcmask 883712   ;;  %vm1634_vm7 = vcmask 752640   ;;  %vm1902_vm8 = vcmask 744448  }
   0xc   :  { %290 = vrot.lane.b32.xlu1 %v2623_v5, %s2563_s16  ;;  %280 = vrot.lane.b32.xlu0 %v2602_v1, %s2563_s16  ;;  %v1610_v13 = vld [vmem:[%s2895_s0 + $0x18] sm:$0xf]  ;;  %vm2170_vm9 = vcmask 736256  }
   0xd   :  { %380 = vmatprep.mubr.f32.mxu1 %v2564_v7  ;;  %451 = vmatprep.mubr.f32.mxu0 %v2564_v7  ;;  %v1878_v14 = vld [vmem:[%s2895_s0 + $0x18] sm:$0xf] }
   0xe   :  { %2537 = vset.pattern.permute.xlu0 %v2572_v15  ;;  %v2146_v16 = vld [vmem:[%s2895_s0 + $0x18] sm:$0xf] }
   0xf   :  { %v2466_v53 = vld [vmem:[%s2896_s1 + $0x18] sm:$0xff] }
  0x10   :  { %550 = vrot.lane.b32.xlu1 %v2610_v3, %s2565_s23  ;;  %292 = vrot.lane.b32.xlu0 %v270_v8, %s2563_s16 }
  0x14   :  { %548 = vrot.lane.b32.xlu1 %v2602_v1, %s2565_s23  ;;  %552 = vrot.lane.b32.xlu0 %v2597_v0, %s2565_s23 }
  0x18   :  { %556 = vrot.lane.b32.xlu1 %v2619_v4, %s2565_s23  ;;  %554 = vrot.lane.b32.xlu0 %v2606_v2, %s2565_s23 }
  0x1c   :  { %560 = vrot.lane.b32.xlu1 %v538_v9, %s2565_s23  ;;  %558 = vrot.lane.b32.xlu0 %v2623_v5, %s2565_s23 }
  0x20   :  { %820 = vrot.lane.b32.xlu1 %v2597_v0, %s2566_s26  ;;  %818 = vrot.lane.b32.xlu0 %v2610_v3, %s2566_s26 }
  0x24   :  { %824 = vrot.lane.b32.xlu1 %v2619_v4, %s2566_s26  ;;  %822 = vrot.lane.b32.xlu0 %v2606_v2, %s2566_s26 }
  0x28   :  { %826 = vrot.lane.b32.xlu1 %v2623_v5, %s2566_s26  ;;  %816 = vrot.lane.b32.xlu0 %v2602_v1, %s2566_s26 }
  0x2c   :  { %1086 = vrot.lane.b32.xlu1 %v2610_v3, %s2567_s29  ;;  %828 = vrot.lane.b32.xlu0 %v806_v10, %s2566_s26 }
  0x30   :  { %1084 = vrot.lane.b32.xlu1 %v2602_v1, %s2567_s29  ;;  %1088 = vrot.lane.b32.xlu0 %v2597_v0, %s2567_s29 }
  0x34   :  { %1092 = vrot.lane.b32.xlu1 %v2619_v4, %s2567_s29  ;;  %1090 = vrot.lane.b32.xlu0 %v2606_v2, %s2567_s29 }
  0x38   :  { %1096 = vrot.lane.b32.xlu1 %v1074_v11, %s2567_s29  ;;  %1094 = vrot.lane.b32.xlu0 %v2623_v5, %s2567_s29 }
  0x3c   :  { %1356 = vrot.lane.b32.xlu1 %v2597_v0, %s2568_s5  ;;  %1354 = vrot.lane.b32.xlu0 %v2610_v3, %s2568_s5 }
  0x40   :  { %1360 = vrot.lane.b32.xlu1 %v2619_v4, %s2568_s5  ;;  %1358 = vrot.lane.b32.xlu0 %v2606_v2, %s2568_s5 }
  0x44   :  { %1362 = vrot.lane.b32.xlu1 %v2623_v5, %s2568_s5  ;;  %1352 = vrot.lane.b32.xlu0 %v2602_v1, %s2568_s5 }
  0x48   :  { %1622 = vrot.lane.b32.xlu1 %v2610_v3, %s2569_s8  ;;  %1364 = vrot.lane.b32.xlu0 %v1342_v12, %s2568_s5 }
  0x4c   :  { %1620 = vrot.lane.b32.xlu1 %v2602_v1, %s2569_s8  ;;  %1624 = vrot.lane.b32.xlu0 %v2597_v0, %s2569_s8 }
  0x50   :  { %1628 = vrot.lane.b32.xlu1 %v2619_v4, %s2569_s8  ;;  %1626 = vrot.lane.b32.xlu0 %v2606_v2, %s2569_s8 }
  0x54   :  { %1632 = vrot.lane.b32.xlu1 %v1610_v13, %s2569_s8  ;;  %1630 = vrot.lane.b32.xlu0 %v2623_v5, %s2569_s8 }
  0x58   :  { %1892 = vrot.lane.b32.xlu1 %v2597_v0, %s2570_s11  ;;  %1890 = vrot.lane.b32.xlu0 %v2610_v3, %s2570_s11 }
  0x5c   :  { %1896 = vrot.lane.b32.xlu1 %v2619_v4, %s2570_s11  ;;  %1894 = vrot.lane.b32.xlu0 %v2606_v2, %s2570_s11 }
  0x60   :  { %1898 = vrot.lane.b32.xlu1 %v2623_v5, %s2570_s11  ;;  %1888 = vrot.lane.b32.xlu0 %v2602_v1, %s2570_s11 }
  0x64   :  { %2158 = vrot.lane.b32.xlu1 %v2610_v3, %s2571_s14  ;;  %1900 = vrot.lane.b32.xlu0 %v1878_v14, %s2570_s11 }
  0x68   :  { %2156 = vrot.lane.b32.xlu1 %v2602_v1, %s2571_s14  ;;  %2160 = vrot.lane.b32.xlu0 %v2597_v0, %s2571_s14  ;;  %v2476_v1 = vld [vmem:[%s2896_s1 + $0x20] sm:$0xff] }
  0x6c   :  { %2164 = vrot.lane.b32.xlu1 %v2619_v4, %s2571_s14  ;;  %2162 = vrot.lane.b32.xlu0 %v2606_v2, %s2571_s14 }
  0x70   :  { %2168 = vrot.lane.b32.xlu1 %v2146_v16, %s2571_s14  ;;  %2166 = vrot.lane.b32.xlu0 %v2623_v5, %s2571_s14 }
  0x74   :  { %18 = vperm.xlu0 %2537, %v15_v17  }
  0x76   :  { %v287_v18 = vpop.permute.xlu1 %286  ;;  %v283_v19 = vpop.permute.xlu0 %282 }
  0x7a   :  { %v289_v20 = vpop.permute.xlu1 %288  ;;  %v285_v21 = vpop.permute.xlu0 %284 }
  0x7b   :  { %v298_v22 = vsel %vm294_vm2, %v287_v18, %v289_v20  ;;  %v296_v23 = vsel %vm294_vm2, %v283_v19, %v285_v21  ;;  %v297_v24 = vsel %vm294_vm2, %v285_v21, %v287_v18  ;;  %v2486_v18 = vld [vmem:[%s2896_s1 + $0x28] sm:$0xff] }
  0x7c   :  { %2447 = vmatprep.subr.msk.mxu1 %vm35_vm0, %v296_v23  ;;  %2450 = vmatprep.subr.msk.mxu0 %vm35_vm0, %v298_v22 }
  0x7d   :  { %2451 = vmatpush1.msk.msra.mxu0 %vm35_vm0, %v297_v24 }
  0x7e   :  { %v291_v26 = vpop.permute.xlu1 %290  ;;  %v281_v27 = vpop.permute.xlu0 %280  ;;  %2452 = vmatmul.mubr.msk.f32.vlgmr.msra.gmra.mxu0 %vm31_vm1, %v2446_v25 }
  0x7f   :  { %v295_v28 = vsel %vm294_vm2, %v281_v27, %v283_v19  ;;  %648 = vmatprep.mubr.f32.mxu0 %v2564_v7  ;;  %v299_v32 = vsel %vm294_vm2, %v289_v20, %v291_v26 }
  0x80   :  { %2448 = vmatpush1.msk.msra.mxu1 %vm35_vm0, %v295_v28 }
  0x81   :  { %2449 = vmatmul.mubr.msk.f32.vlgmr.msra.gmra.mxu1 %vm31_vm1, %v2446_v25 }
  0x82   :  { %v551_v29 = vpop.permute.xlu1 %550  ;;  %v293_v30 = vpop.permute.xlu0 %292  ;;  %522 = vmatprep.mubr.f32.mxu1 %v2564_v7 }
  0x83   :  { %v300_v31 = vsel %vm294_vm2, %v291_v26, %v293_v30  ;;  %v2496_v30 = vld [vmem:[%s2896_s1 + $0x30] sm:$0xff] }
  0x84   :  { %2453 = vmatprep.subr.msk.mxu1 %vm35_vm0, %v300_v31 }
  0x85   :  { %2454 = vmatpush1.msk.msra.mxu1 %vm35_vm0, %v299_v32 }
  0x86   :  { %v549_v33 = vpop.permute.xlu1 %548  ;;  %v553_v34 = vpop.permute.xlu0 %552  ;;  %2455 = vmatmul.mubr.msk.f32.vlgmr.msra.gmra.mxu1 %vm31_vm1, %v2446_v25 }
  0x87   :  { %v563_v35 = vsel %vm562_vm3, %v549_v33, %v551_v29  ;;  %v564_v36 = vsel %vm562_vm3, %v551_v29, %v553_v34  ;;  %719 = vmatprep.mubr.f32.mxu1 %v2564_v7 }
  0x88   :  { %2457 = vmatprep.subr.msk.mxu0 %vm35_vm0, %v564_v36 }
  0x89   :  { %2458 = vmatpush1.msk.msra.mxu0 %vm35_vm0, %v563_v35 }
  0x8a   :  { %v557_v38 = vpop.permute.xlu1 %556  ;;  %v555_v39 = vpop.permute.xlu0 %554  ;;  %2459 = vmatmul.mubr.msk.f32.vlgmr.msra.gmra.mxu0 %vm31_vm1, %v2456_v37 }
  0x8b   :  { %v565_v40 = vsel %vm562_vm3, %v553_v34, %v555_v39  ;;  %v566_v41 = vsel %vm562_vm3, %v555_v39, %v557_v38  ;;  %790 = vmatprep.mubr.f32.mxu0 %v2564_v7 }
  0x8c   :  { %2460 = vmatprep.subr.msk.mxu1 %vm35_vm0, %v566_v41 }
  0x8d   :  { %2461 = vmatpush1.msk.msra.mxu1 %vm35_vm0, %v565_v40 }
  0x8e   :  { %v561_v42 = vpop.permute.xlu1 %560  ;;  %v559_v43 = vpop.permute.xlu0 %558  ;;  %2462 = vmatmul.mubr.msk.f32.vlgmr.msra.gmra.mxu1 %vm31_vm1, %v2456_v37 }
  0x8f   :  { %v567_v44 = vsel %vm562_vm3, %v557_v38, %v559_v43  ;;  %v568_v45 = vsel %vm562_vm3, %v559_v43, %v561_v42  ;;  %916 = vmatprep.mubr.f32.mxu1 %v2564_v7 }
  0x90   :  { %2463 = vmatprep.subr.msk.mxu0 %vm35_vm0, %v568_v45 }
  0x91   :  { %2464 = vmatpush1.msk.msra.mxu0 %vm35_vm0, %v567_v44 }
  0x92   :  { %v821_v46 = vpop.permute.xlu1 %820  ;;  %v819_v47 = vpop.permute.xlu0 %818  ;;  %2465 = vmatmul.mubr.msk.f32.vlgmr.msra.gmra.mxu0 %vm31_vm1, %v2456_v37 }
  0x93   :  { %v832_v48 = vsel %vm830_vm4, %v819_v47, %v821_v46  ;;  %987 = vmatprep.mubr.f32.mxu0 %v2564_v7 }
  0x94   :  { %2467 = vmatprep.subr.msk.mxu1 %vm35_vm0, %v832_v48 }
  0x96   :  { %v825_v49 = vpop.permute.xlu1 %824  ;;  %v823_v50 = vpop.permute.xlu0 %822 }
  0x97   :  { %v833_v51 = vsel %vm830_vm4, %v821_v46, %v823_v50  ;;  %v834_v52 = vsel %vm830_vm4, %v823_v50, %v825_v49  ;;  %v2506_v46 = vld [vmem:[%s2896_s1 + $0x38] sm:$0xff] }
  0x98   :  { %2470 = vmatprep.subr.msk.mxu0 %vm35_vm0, %v834_v52 }
  0x99   :  { %2471 = vmatpush1.msk.msra.mxu0 %vm35_vm0, %v833_v51 }
  0x9a   :  { %v827_v54 = vpop.permute.xlu1 %826  ;;  %v817_v55 = vpop.permute.xlu0 %816  ;;  %2472 = vmatmul.mubr.msk.f32.vlgmr.msra.gmra.mxu0 %vm31_vm1, %v2466_v53 }
  0x9b   :  { %v831_v56 = vsel %vm830_vm4, %v817_v55, %v819_v47  ;;  %1184 = vmatprep.mubr.f32.mxu0 %v2564_v7  ;;  %v835_v60 = vsel %vm830_vm4, %v825_v49, %v827_v54 }
  0x9c   :  { %2468 = vmatpush1.msk.msra.mxu1 %vm35_vm0, %v831_v56 }
  0x9d   :  { %2469 = vmatmul.mubr.msk.f32.vlgmr.msra.gmra.mxu1 %vm31_vm1, %v2466_v53 }
  0x9e   :  { %v1087_v57 = vpop.permute.xlu1 %1086  ;;  %v829_v58 = vpop.permute.xlu0 %828  ;;  %1058 = vmatprep.mubr.f32.mxu1 %v2564_v7 }
  0x9f   :  { %v836_v59 = vsel %vm830_vm4, %v827_v54, %v829_v58  ;;  %v2516_v58 = vld [vmem:[%s2896_s1 + $0x40] sm:$0xff]  ;;  %s2573_s1 = smov [#allocation2]  }
  0xa0   :  { %2473 = vmatprep.subr.msk.mxu1 %vm35_vm0, %v836_v59  ;;  %s2429_s6 = sshll.u32 %s2573_s1, 4  ;;  %s2430_s6 = int_to_ptr.vmem [resolvable:$true] %s2429_s6 }
  0xa1   :  { %2474 = vmatpush1.msk.msra.mxu1 %vm35_vm0, %v835_v60  ;;  %s2541_s7 = scalar_lea.vmem %s2430_s6, 768  ;;  %p2546_p1 = scmp.lt.s32.totalorder %s2430_s6, %s2430_s6 }
  0xa2   :  { %v1085_v61 = vpop.permute.xlu1 %1084  ;;  %v1089_v62 = vpop.permute.xlu0 %1088  ;;  %2475 = vmatmul.mubr.msk.f32.vlgmr.msra.gmra.mxu1 %vm31_vm1, %v2466_v53  ;;  %p2542_p0 = scmp.ne.s32.totalorder %s2430_s6, %s2541_s7  ;;  %p2547_p2 = scmp.lt.s32.totalorder %s2541_s7, %s2541_s7 }
  0xa3   :  { %v1099_v63 = vsel %vm1098_vm5, %v1085_v61, %v1087_v57  ;;  %v1100_v0 = vsel %vm1098_vm5, %v1087_v57, %v1089_v62  ;;  %1255 = vmatprep.mubr.f32.mxu1 %v2564_v7 }
  0xa4   :  { %2477 = vmatprep.subr.msk.mxu0 %vm35_vm0, %v1100_v0  ;;  %p2548_p3 = por %p2547_p2, %p2546_p1 }
  0xa5   :  { %2478 = vmatpush1.msk.msra.mxu0 %vm35_vm0, %v1099_v63 }
  0xa6   :  { %v1093_v2 = vpop.permute.xlu1 %1092  ;;  %v1091_v3 = vpop.permute.xlu0 %1090  ;;  %2479 = vmatmul.mubr.msk.f32.vlgmr.msra.gmra.mxu0 %vm31_vm1, %v2476_v1  ;;  %p2549_p4 = pnand %p2548_p3, %p2542_p0 }
  0xa7   :  { %v1101_v4 = vsel %vm1098_vm5, %v1089_v62, %v1091_v3  ;;  %v1102_v5 = vsel %vm1098_vm5, %v1091_v3, %v1093_v2  ;;  %1326 = vmatprep.mubr.f32.mxu0 %v2564_v7 }
  0xa8   :  { %2480 = vmatprep.subr.msk.mxu1 %vm35_vm0, %v1102_v5 }
  0xa9   :  { %2481 = vmatpush1.msk.msra.mxu1 %vm35_vm0, %v1101_v4 }
  0xaa   :  { %v1097_v6 = vpop.permute.xlu1 %1096  ;;  %v1095_v8 = vpop.permute.xlu0 %1094  ;;  %2482 = vmatmul.mubr.msk.f32.vlgmr.msra.gmra.mxu1 %vm31_vm1, %v2476_v1 }
  0xab   :  { %v1103_v9 = vsel %vm1098_vm5, %v1093_v2, %v1095_v8  ;;  %v1104_v10 = vsel %vm1098_vm5, %v1095_v8, %v1097_v6  ;;  %1452 = vmatprep.mubr.f32.mxu1 %v2564_v7 }
  0xac   :  { %2483 = vmatprep.subr.msk.mxu0 %vm35_vm0, %v1104_v10 }
  0xad   :  { %2484 = vmatpush1.msk.msra.mxu0 %vm35_vm0, %v1103_v9 }
  0xae   :  { %v1357_v11 = vpop.permute.xlu1 %1356  ;;  %v1355_v12 = vpop.permute.xlu0 %1354  ;;  %2485 = vmatmul.mubr.msk.f32.vlgmr.msra.gmra.mxu0 %vm31_vm1, %v2476_v1 }
  0xaf   :  { %v1368_v13 = vsel %vm1366_vm6, %v1355_v12, %v1357_v11  ;;  %1523 = vmatprep.mubr.f32.mxu0 %v2564_v7 }
  0xb0   :  { %2487 = vmatprep.subr.msk.mxu1 %vm35_vm0, %v1368_v13 }
  0xb2   :  { %v1361_v14 = vpop.permute.xlu1 %1360  ;;  %v1359_v15 = vpop.permute.xlu0 %1358 }
  0xb3   :  { %v1369_v16 = vsel %vm1366_vm6, %v1357_v11, %v1359_v15  ;;  %v1370_v17 = vsel %vm1366_vm6, %v1359_v15, %v1361_v14 }
  0xb4   :  { %2490 = vmatprep.subr.msk.mxu0 %vm35_vm0, %v1370_v17 }
  0xb5   :  { %2491 = vmatpush1.msk.msra.mxu0 %vm35_vm0, %v1369_v16 }
  0xb6   :  { %v1363_v19 = vpop.permute.xlu1 %1362  ;;  %v1353_v20 = vpop.permute.xlu0 %1352  ;;  %2492 = vmatmul.mubr.msk.f32.vlgmr.msra.gmra.mxu0 %vm31_vm1, %v2486_v18 }
  0xb7   :  { %v1367_v21 = vsel %vm1366_vm6, %v1353_v20, %v1355_v12  ;;  %1720 = vmatprep.mubr.f32.mxu0 %v2564_v7  ;;  %v1371_v25 = vsel %vm1366_vm6, %v1361_v14, %v1363_v19 }
  0xb8   :  { %2488 = vmatpush1.msk.msra.mxu1 %vm35_vm0, %v1367_v21 }
  0xb9   :  { %2489 = vmatmul.mubr.msk.f32.vlgmr.msra.gmra.mxu1 %vm31_vm1, %v2486_v18 }
  0xba   :  { %v1623_v22 = vpop.permute.xlu1 %1622  ;;  %v1365_v23 = vpop.permute.xlu0 %1364  ;;  %1594 = vmatprep.mubr.f32.mxu1 %v2564_v7 }
  0xbb   :  { %v1372_v24 = vsel %vm1366_vm6, %v1363_v19, %v1365_v23 }
  0xbc   :  { %2493 = vmatprep.subr.msk.mxu1 %vm35_vm0, %v1372_v24 }
  0xbd   :  { %2494 = vmatpush1.msk.msra.mxu1 %vm35_vm0, %v1371_v25 }
  0xbe   :  { %v1621_v26 = vpop.permute.xlu1 %1620  ;;  %v1625_v27 = vpop.permute.xlu0 %1624  ;;  %2495 = vmatmul.mubr.msk.f32.vlgmr.msra.gmra.mxu1 %vm31_vm1, %v2486_v18 }
  0xbf   :  { %v1635_v28 = vsel %vm1634_vm7, %v1621_v26, %v1623_v22  ;;  %v1636_v29 = vsel %vm1634_vm7, %v1623_v22, %v1625_v27  ;;  %1791 = vmatprep.mubr.f32.mxu1 %v2564_v7 }
  0xc0   :  { %2497 = vmatprep.subr.msk.mxu0 %vm35_vm0, %v1636_v29 }
  0xc1   :  { %2498 = vmatpush1.msk.msra.mxu0 %vm35_vm0, %v1635_v28 }
  0xc2   :  { %v1629_v31 = vpop.permute.xlu1 %1628  ;;  %v1627_v32 = vpop.permute.xlu0 %1626  ;;  %2499 = vmatmul.mubr.msk.f32.vlgmr.msra.gmra.mxu0 %vm31_vm1, %v2496_v30 }
  0xc3   :  { %v1637_v33 = vsel %vm1634_vm7, %v1625_v27, %v1627_v32  ;;  %v1638_v34 = vsel %vm1634_vm7, %v1627_v32, %v1629_v31  ;;  %1862 = vmatprep.mubr.f32.mxu0 %v2564_v7 }
  0xc4   :  { %2500 = vmatprep.subr.msk.mxu1 %vm35_vm0, %v1638_v34 }
  0xc5   :  { %2501 = vmatpush1.msk.msra.mxu1 %vm35_vm0, %v1637_v33 }
  0xc6   :  { %v1633_v35 = vpop.permute.xlu1 %1632  ;;  %v1631_v36 = vpop.permute.xlu0 %1630  ;;  %2502 = vmatmul.mubr.msk.f32.vlgmr.msra.gmra.mxu1 %vm31_vm1, %v2496_v30 }
  0xc7   :  { %v1639_v37 = vsel %vm1634_vm7, %v1629_v31, %v1631_v36  ;;  %v1640_v38 = vsel %vm1634_vm7, %v1631_v36, %v1633_v35  ;;  %1988 = vmatprep.mubr.f32.mxu1 %v2564_v7  ;;  %v114_v3 = vpop.f32.mrf.mxu0 }
  0xc8   :  { %2503 = vmatprep.subr.msk.mxu0 %vm35_vm0, %v1640_v38 }
  0xc9   :  { %2504 = vmatpush1.msk.msra.mxu0 %vm35_vm0, %v1639_v37 }
  0xca   :  { %v1893_v39 = vpop.permute.xlu1 %1892  ;;  %v1891_v40 = vpop.permute.xlu0 %1890  ;;  %2505 = vmatmul.mubr.msk.f32.vlgmr.msra.gmra.mxu0 %vm31_vm1, %v2496_v30 }
  0xcb   :  { %v1904_v41 = vsel %vm1902_vm8, %v1891_v40, %v1893_v39  ;;  %2059 = vmatprep.mubr.f32.mxu0 %v2564_v7  ;;  %v185_v4 = vpop.f32.mrf.mxu1 }
  0xcc   :  { %2507 = vmatprep.subr.msk.mxu1 %vm35_vm0, %v1904_v41 }
  0xcd   :  { %v187_v6 = vpop.f32.mrf.mxu1 }
  0xce   :  { %v1897_v42 = vpop.permute.xlu1 %1896  ;;  %v1895_v43 = vpop.permute.xlu0 %1894 }
  0xcf   :  { %v1905_v44 = vsel %vm1902_vm8, %v1893_v39, %v1895_v43  ;;  %v1906_v45 = vsel %vm1902_vm8, %v1895_v43, %v1897_v42 }
  0xd0   :  { %2510 = vmatprep.subr.msk.mxu0 %vm35_vm0, %v1906_v45 }
  0xd1   :  { %2511 = vmatpush1.msk.msra.mxu0 %vm35_vm0, %v1905_v44 }
  0xd2   :  { %v1899_v47 = vpop.permute.xlu1 %1898  ;;  %v1889_v48 = vpop.permute.xlu0 %1888  ;;  %2512 = vmatmul.mubr.msk.f32.vlgmr.msra.gmra.mxu0 %vm31_vm1, %v2506_v46 }
  0xd3   :  { %v1903_v49 = vsel %vm1902_vm8, %v1889_v48, %v1891_v40  ;;  %2256 = vmatprep.mubr.f32.mxu0 %v2564_v7  ;;  %v1907_v53 = vsel %vm1902_vm8, %v1897_v42, %v1899_v47 }
  0xd4   :  { %2508 = vmatpush1.msk.msra.mxu1 %vm35_vm0, %v1903_v49 }
  0xd5   :  { %2509 = vmatmul.mubr.msk.f32.vlgmr.msra.gmra.mxu1 %vm31_vm1, %v2506_v46 }
  0xd6   :  { %v2159_v50 = vpop.permute.xlu1 %2158  ;;  %v1901_v51 = vpop.permute.xlu0 %1900  ;;  %2130 = vmatprep.mubr.f32.mxu1 %v2564_v7 }
  0xd7   :  { %v1908_v52 = vsel %vm1902_vm8, %v1899_v47, %v1901_v51 }
  0xd8   :  { %2513 = vmatprep.subr.msk.mxu1 %vm35_vm0, %v1908_v52 }
  0xd9   :  { %2514 = vmatpush1.msk.msra.mxu1 %vm35_vm0, %v1907_v53 }
  0xda   :  { %v2157_v54 = vpop.permute.xlu1 %2156  ;;  %v2161_v55 = vpop.permute.xlu0 %2160  ;;  %2515 = vmatmul.mubr.msk.f32.vlgmr.msra.gmra.mxu1 %vm31_vm1, %v2506_v46 }
  0xdb   :  { %v2171_v56 = vsel %vm2170_vm9, %v2157_v54, %v2159_v50  ;;  %v2172_v57 = vsel %vm2170_vm9, %v2159_v50, %v2161_v55  ;;  %2327 = vmatprep.mubr.f32.mxu1 %v2564_v7 }
  0xdc   :  { %2517 = vmatprep.subr.msk.mxu0 %vm35_vm0, %v2172_v57 }
  0xdd   :  { %2518 = vmatpush1.msk.msra.mxu0 %vm35_vm0, %v2171_v56 }
  0xde   :  { %v2165_v59 = vpop.permute.xlu1 %2164  ;;  %v2163_v60 = vpop.permute.xlu0 %2162  ;;  %2519 = vmatmul.mubr.msk.f32.vlgmr.msra.gmra.mxu0 %vm31_vm1, %v2516_v58 }
  0xdf   :  { %v2173_v61 = vsel %vm2170_vm9, %v2161_v55, %v2163_v60  ;;  %v2174_v62 = vsel %vm2170_vm9, %v2163_v60, %v2165_v59  ;;  %2398 = vmatprep.mubr.f32.mxu0 %v2564_v7  ;;  %v116_v7 = vpop.f32.mrf.mxu0 }
  0xe0   :  { %2520 = vmatprep.subr.msk.mxu1 %vm35_vm0, %v2174_v62 }
  0xe1   :  { %2521 = vmatpush1.msk.msra.mxu1 %vm35_vm0, %v2173_v61  ;;  %v256_v5 = vpop.f32.mrf.mxu0 }
  0xe2   :  { %v2169_v63 = vpop.permute.xlu1 %2168  ;;  %v2167_v0 = vpop.permute.xlu0 %2166  ;;  %2522 = vmatmul.mubr.msk.f32.vlgmr.msra.gmra.mxu1 %vm31_vm1, %v2516_v58 }
  0xe3   :  { %v2175_v1 = vsel %vm2170_vm9, %v2165_v59, %v2167_v0  ;;  %v2176_v2 = vsel %vm2170_vm9, %v2167_v0, %v2169_v63  ;;  %v258_v8 = vpop.f32.mrf.mxu0 }
  0xe4   :  { %2523 = vmatprep.subr.msk.mxu0 %vm35_vm0, %v2176_v2 }
  0xe5   :  { %2524 = vmatpush1.msk.msra.mxu0 %vm35_vm0, %v2175_v1 }
  0xe6   :  { %2525 = vmatmul.mubr.msk.f32.vlgmr.msra.gmra.mxu0 %vm31_vm1, %v2516_v58 }
  0xef   :  { %v19_v34 = vpop.permute.xlu0 %18 }
  0xf0   :  { %v261_v36 = vadd.f32 %v114_v3, %v19_v34  ;;  %v262_v38 = vadd.f32 %v116_v7, %v19_v34  ;;  %v263_v41 = vadd.f32 %v185_v4, %v19_v34  ;;  %v264_v44 = vadd.f32 %v187_v6, %v19_v34 }
  0xf1   :  { %v265_v45 = vadd.f32 %v256_v5, %v19_v34  ;;  %v266_v50 = vadd.f32 %v258_v8, %v19_v34 }
 0x13e   :  { %v453_v10 = vpop.f32.mrf.mxu0 }
 0x13f   :  { %v531_v48 = vadd.f32 %v453_v10, %v263_v41 }
 0x140   :  { %v455_v12 = vpop.f32.mrf.mxu0 }
 0x141   :  { %v382_v9 = vpop.f32.mrf.mxu1  ;;  %v532_v52 = vadd.f32 %v455_v12, %v264_v44 }
 0x142   :  { %v529_v40 = vadd.f32 %v382_v9, %v261_v36 }
 0x143   :  { %v384_v11 = vpop.f32.mrf.mxu1 }
 0x144   :  { %v530_v43 = vadd.f32 %v384_v11, %v262_v38 }
 0x146   :  { %v524_v13 = vpop.f32.mrf.mxu1 }
 0x147   :  { %v533_v54 = vadd.f32 %v524_v13, %v265_v45 }
 0x148   :  { %v526_v15 = vpop.f32.mrf.mxu1 }
 0x149   :  { %v534_v58 = vadd.f32 %v526_v15, %v266_v50 }
 0x14a   :  { %v650_v14 = vpop.f32.mrf.mxu0 }
 0x14b   :  { %v797_v47 = vadd.f32 %v650_v14, %v529_v40 }
 0x14c   :  { %v652_v16 = vpop.f32.mrf.mxu0 }
 0x14d   :  { %v798_v51 = vadd.f32 %v652_v16, %v530_v43 }
 0x14e   :  { %v721_v17 = vpop.f32.mrf.mxu1 }
 0x14f   :  { %v799_v57 = vadd.f32 %v721_v17, %v531_v48 }
 0x150   :  { %v723_v19 = vpop.f32.mrf.mxu1 }
 0x151   :  { %v800_v61 = vadd.f32 %v723_v19, %v532_v52 }
 0x152   :  { %v792_v18 = vpop.f32.mrf.mxu0 }
 0x153   :  { %v801_v63 = vadd.f32 %v792_v18, %v533_v54 }
 0x154   :  { %v794_v20 = vpop.f32.mrf.mxu0 }
 0x155   :  { %v802_v3 = vadd.f32 %v794_v20, %v534_v58 }
 0x15a   :  { %v989_v22 = vpop.f32.mrf.mxu0 }
 0x15b   :  { %v1067_v1 = vadd.f32 %v989_v22, %v799_v57 }
 0x15c   :  { %v991_v24 = vpop.f32.mrf.mxu0 }
 0x15d   :  { %v918_v21 = vpop.f32.mrf.mxu1  ;;  %v1068_v5 = vadd.f32 %v991_v24, %v800_v61 }
 0x15e   :  { %v1065_v56 = vadd.f32 %v918_v21, %v797_v47 }
 0x15f   :  { %v920_v23 = vpop.f32.mrf.mxu1 }
 0x160   :  { %v1066_v60 = vadd.f32 %v920_v23, %v798_v51 }
 0x162   :  { %v1060_v25 = vpop.f32.mrf.mxu1 }
 0x163   :  { %v1069_v6 = vadd.f32 %v1060_v25, %v801_v63 }
 0x164   :  { %v1062_v27 = vpop.f32.mrf.mxu1 }
 0x165   :  { %v1070_v12 = vadd.f32 %v1062_v27, %v802_v3 }
 0x166   :  { %v1186_v26 = vpop.f32.mrf.mxu0 }
 0x167   :  { %v1333_v0 = vadd.f32 %v1186_v26, %v1065_v56 }
 0x168   :  { %v1188_v28 = vpop.f32.mrf.mxu0 }
 0x169   :  { %v1334_v4 = vadd.f32 %v1188_v28, %v1066_v60 }
 0x16a   :  { %v1257_v29 = vpop.f32.mrf.mxu1 }
 0x16b   :  { %v1335_v10 = vadd.f32 %v1257_v29, %v1067_v1 }
 0x16c   :  { %v1259_v31 = vpop.f32.mrf.mxu1 }
 0x16d   :  { %v1336_v13 = vadd.f32 %v1259_v31, %v1068_v5 }
 0x16e   :  { %v1328_v30 = vpop.f32.mrf.mxu0 }
 0x16f   :  { %v1337_v16 = vadd.f32 %v1328_v30, %v1069_v6 }
 0x170   :  { %v1330_v32 = vpop.f32.mrf.mxu0 }
 0x171   :  { %v1338_v23 = vadd.f32 %v1330_v32, %v1070_v12 }
 0x176   :  { %v1525_v35 = vpop.f32.mrf.mxu0 }
 0x177   :  { %v1603_v18 = vadd.f32 %v1525_v35, %v1335_v10 }
 0x178   :  { %v1527_v39 = vpop.f32.mrf.mxu0 }
 0x179   :  { %v1454_v33 = vpop.f32.mrf.mxu1  ;;  %v1604_v26 = vadd.f32 %v1527_v39, %v1336_v13 }
 0x17a   :  { %v1601_v11 = vadd.f32 %v1454_v33, %v1333_v0 }
 0x17b   :  { %v1456_v37 = vpop.f32.mrf.mxu1 }
 0x17c   :  { %v1602_v14 = vadd.f32 %v1456_v37, %v1334_v4 }
 0x17e   :  { %v1596_v42 = vpop.f32.mrf.mxu1 }
 0x17f   :  { %v1605_v34 = vadd.f32 %v1596_v42, %v1337_v16 }
 0x180   :  { %v1598_v49 = vpop.f32.mrf.mxu1 }
 0x181   :  { %v1606_v38 = vadd.f32 %v1598_v49, %v1338_v23 }
 0x182   :  { %v1722_v46 = vpop.f32.mrf.mxu0 }
 0x183   :  { %v1869_v15 = vadd.f32 %v1722_v46, %v1601_v11 }
 0x184   :  { %v1724_v55 = vpop.f32.mrf.mxu0 }
 0x185   :  { %v1870_v21 = vadd.f32 %v1724_v55, %v1602_v14 }
 0x186   :  { %v1793_v53 = vpop.f32.mrf.mxu1 }
 0x187   :  { %v1871_v28 = vadd.f32 %v1793_v53, %v1603_v18 }
 0x188   :  { %v1795_v62 = vpop.f32.mrf.mxu1 }
 0x189   :  { %v1872_v33 = vadd.f32 %v1795_v62, %v1604_v26 }
 0x18a   :  { %v1864_v59 = vpop.f32.mrf.mxu0 }
 0x18b   :  { %v1873_v40 = vadd.f32 %v1864_v59, %v1605_v34 }
 0x18c   :  { %v1866_v7 = vpop.f32.mrf.mxu0 }
 0x18d   :  { %v1874_v44 = vadd.f32 %v1866_v7, %v1606_v38 }
 0x192   :  { %v2061_v8 = vpop.f32.mrf.mxu0 }
 0x193   :  { %v2139_v27 = vadd.f32 %v2061_v8, %v1871_v28 }
 0x194   :  { %v2063_v17 = vpop.f32.mrf.mxu0 }
 0x195   :  { %v1990_v2 = vpop.f32.mrf.mxu1  ;;  %v2140_v41 = vadd.f32 %v2063_v17, %v1872_v33 }
 0x196   :  { %v2137_v22 = vadd.f32 %v1990_v2, %v1869_v15 }
 0x197   :  { %v1992_v9 = vpop.f32.mrf.mxu1 }
 0x198   :  { %v2138_v24 = vadd.f32 %v1992_v9, %v1870_v21 }
 0x19a   :  { %v2132_v19 = vpop.f32.mrf.mxu1 }
 0x19b   :  { %v2141_v39 = vadd.f32 %v2132_v19, %v1873_v40 }
 0x19c   :  { %v2134_v36 = vpop.f32.mrf.mxu1 }
 0x19d   :  { %v2142_v47 = vadd.f32 %v2134_v36, %v1874_v44 }
 0x19e   :  { %v2258_v20 = vpop.f32.mrf.mxu0 }
 0x19f   :  { %v2405_v25 = vadd.f32 %v2258_v20, %v2137_v22 }
 0x1a0   :  { %v2260_v29 = vpop.f32.mrf.mxu0 }
 0x1a1   :  { %v2411_v31 = vmax.f32 %v2405_v25, 0.0  ;;  %v2406_v37 = vadd.f32 %v2260_v29, %v2138_v24 }
 0x1a2   :  { %v2329_v30 = vpop.f32.mrf.mxu1 }
 0x1a3   :  { %2417 = vst [vmem:[#allocation2] sm:$0xff] %v2411_v31  ;;  %v2412_v35 = vmax.f32 %v2406_v37, 0.0  ;;  %v2407_v43 = vadd.f32 %v2329_v30, %v2139_v27 }
 0x1a4   :  { %v2331_v32 = vpop.f32.mrf.mxu1 }
 0x1a5   :  { %2418 = vst [vmem:[#allocation2 + $0x8] sm:$0xff] %v2412_v35  ;;  %v2413_v45 = vmax.f32 %v2407_v43, 0.0  ;;  %v2408_v46 = vadd.f32 %v2331_v32, %v2140_v41 }
 0x1a6   :  { %v2400_v42 = vpop.f32.mrf.mxu0 }
 0x1a7   :  { %2419 = vst [vmem:[#allocation2 + $0x10] sm:$0xff] %v2413_v45  ;;  %v2414_v48 = vmax.f32 %v2408_v46, 0.0  ;;  %v2409_v50 = vadd.f32 %v2400_v42, %v2141_v39 }
 0x1a8   :  { %v2402_v51 = vpop.f32.mrf.mxu0 }
 0x1a9   :  { %2420 = vst [vmem:[#allocation2 + $0x18] sm:$0xff] %v2414_v48  ;;  %v2415_v49 = vmax.f32 %v2409_v50, 0.0  ;;  %v2410_v52 = vadd.f32 %v2402_v51, %v2142_v47 }
 0x1ab   :  { %2421 = vst [vmem:[#allocation2 + $0x20] sm:$0xff] %v2415_v49  ;;  %v2416_v53 = vmax.f32 %v2410_v52, 0.0 }
 0x1ad   :  { %2422 = vst [vmem:[#allocation2 + $0x28] sm:$0xff] %v2416_v53 }
 0x1ae   :  { %2552 = shalt.err (!%p2549_p4)
}
 0x1af   :  { %2432 = dma.vmem_to_hbm [thread:$0]  %s2430_s6, 768, %s2898_s3, [#allocation3]  }
 0x1b0   :  { %2561 = dma.done.wait [#allocation3], 768  }
 0x1b1   :  { %2562 = vsyncadd [#allocation3], 4294966528 }
 0x1b2   :  { %2436 = vsyncpa [#allocation3], 1 }

</bundles_post_ra>
